<compile_context>
chip_gen: v6e
topology: v6e:2x2x1
jax: 0.10.0
libtpu: 0.0.40
codegen_flags: <defaults>
</compile_context>

<pallas_src>
import jax
import jax.numpy as jnp
from jax import lax
from jax.experimental import pallas as pl
from jax.experimental.pallas import tpu as pltpu


def _round_up(x, m):
    return (x + m - 1) // m * m


def _round_down(x, m):
    return max(m, x // m * m)


def _cdiv(a, b):
    return (a + b - 1) // b


def _choose_tiles(B, V, itemsize):
    """Pick (tile_b, tile_v): ~4 MiB per input block, lane tile multiple of 128,
    sublane tile a multiple of the dtype's packing (8 f32 / 16 bf16 / 32 int8)."""
    pack = max(8, 32 // itemsize)
    tile_b = min(256, _round_up(B, pack))
    target_bytes = 4 * 1024 * 1024
    tile_v = min(_round_up(V, 128),
                 _round_down(target_bytes // (tile_b * itemsize), 128))
    return tile_b, tile_v


def _make_reg_stats_kernel(B, V, tile_b, tile_v, nb, nj):
    """Builds the kernel with static shapes closed over (for edge masking).

    colsum_ref : (8, TILE_V) f32  running per-sublane-group sum_i |x_ij|
    nnzsum_ref : (8, TILE_V) f32  running per-sublane-group sum_i (x_ij > 0)
    reg_ref / nnz_ref : (1, TILE_V) lane-dense per-vocab-tile outputs,
        written once at the last batch step of each vocab tile.
    """
    ragged_b = (B % tile_b) != 0
    ragged_v = (V % tile_v) != 0
    groups = tile_b // 8

    def kernel(x_ref, reg_ref, nnz_ref, colsum_ref, nnzsum_ref):
        j = pl.program_id(0)          # vocab tile index (parallel)
        b = pl.program_id(1)          # batch tile index (innermost, arbitrary)

        @pl.when(b == 0)
        def _():
            colsum_ref[...] = jnp.zeros_like(colsum_ref)
            nnzsum_ref[...] = jnp.zeros_like(nnzsum_ref)

        def accumulate(mask):
            x = x_ref[...]                       # native dtype (no upcast yet)
            absx = jnp.abs(x)                    # bf16 stays packed on the VPU
            pos = x > 0
            if mask is not None:
                absx = jnp.where(mask, absx, 0)
                pos = jnp.logical_and(pos, mask)
            # vreg-wise accumulation: split the sublane axis into groups of 8
            # and sum over the group axis -> plain vreg adds, no cross-sublane
            # (XLU) work in the inner loop.
            absx32 = absx.astype(jnp.float32).reshape(groups, 8, tile_v)
            pos32 = pos.astype(jnp.float32).reshape(groups, 8, tile_v)
            colsum_ref[...] += jnp.sum(absx32, axis=0)
            nnzsum_ref[...] += jnp.sum(pos32, axis=0)

        # Mask only the ragged edge tiles; interior tiles take the fast path.
        conds = []
        if ragged_v:
            conds.append(j == nj - 1)
        if ragged_b:
            conds.append(b == nb - 1)

        if conds:
            is_edge = conds[0]
            for c in conds[1:]:
                is_edge = jnp.logical_or(is_edge, c)

            @pl.when(jnp.logical_not(is_edge))
            def _():
                accumulate(None)

            @pl.when(is_edge)
            def _():
                rows_left = B - b * tile_b
                cols_left = V - j * tile_v
                # Small (tile_b,1)/(1,tile_v) iotas; broadcast in the select.
                row_ok = (lax.broadcasted_iota(jnp.int32, (tile_b, 1), 0)
                          < rows_left)
                col_ok = (lax.broadcasted_iota(jnp.int32, (1, tile_v), 1)
                          < cols_left)
                accumulate(jnp.logical_and(row_ok, col_ok))
        else:
            accumulate(None)

        # End of the batch sweep for this vocab tile: one 8->1 sublane reduce,
        # then lane-dense stores of this tile's partials.  No cross-vocab
        # carry, so the vocab grid axis is safely "parallel".
        @pl.when(b == nb - 1)
        def _():
            cs = jnp.sum(colsum_ref[...], axis=0, keepdims=True)   # (1, tile_v)
            reg_ref[...] = cs * cs
            nnz_ref[...] = jnp.sum(nnzsum_ref[...], axis=0, keepdims=True)

    return kernel


def _reg_stats(x, *, tile_b=None, tile_v=None):
    """Returns (flops_reg, nnz_per_row) for a [B, V] representation matrix.

    flops_reg   = sum_j ( mean_i |x_ij| )^2          (unweighted FLOPS reg)
    nnz_per_row = mean_i sum_j (x_ij > 0)            (torch num_non_zero)
    """
    B, V = x.shape
    auto_b, auto_v = _choose_tiles(B, V, x.dtype.itemsize)
    tile_b = auto_b if tile_b is None else tile_b
    tile_v = auto_v if tile_v is None else tile_v
    assert tile_b % 8 == 0 and tile_v % 128 == 0

    nb = _cdiv(B, tile_b)
    nj = _cdiv(V, tile_v)
    Vp = nj * tile_v          # lane-dense partial-output width (tail stays 0)

    kernel = _make_reg_stats_kernel(B, V, tile_b, tile_v, nb, nj)

    # TODO(synk): if a v7x profile shows the VALU slot saturated with bf16
    #             inputs, offload the batch-axis accumulation to the MXU via
    #             ones((8, tile_b), bf16) @ abs_x (exact, f32 accumulate).
    reg_parts, nnz_parts = pl.pallas_call(
        kernel,
        out_shape=(
            jax.ShapeDtypeStruct((1, Vp), jnp.float32),
            jax.ShapeDtypeStruct((1, Vp), jnp.float32),
        ),
        grid_spec=pltpu.PrefetchScalarGridSpec(
            num_scalar_prefetch=0,
            grid=(nj, nb),
            # No wrapper-side padding: the last batch/vocab blocks may be
            # partial; their out-of-range region is masked in-kernel.
            # If xprof shows exposed DMA with small blocks, add
            # pipeline_mode=pl.Buffered(3) here.
            in_specs=[pl.BlockSpec((tile_b, tile_v), lambda j, b: (b, j))],
            out_specs=(
                pl.BlockSpec((1, tile_v), lambda j, b: (0, j)),
                pl.BlockSpec((1, tile_v), lambda j, b: (0, j)),
            ),
            scratch_shapes=[
                pltpu.VMEM((8, tile_v), jnp.float32),   # colsum partials
                pltpu.VMEM((8, tile_v), jnp.float32),   # nnz partials
            ],
        ),
        compiler_params=pltpu.CompilerParams(
            # vocab axis has no cross-tile carry -> shard it across TCs (v7x)
            dimension_semantics=("parallel", "arbitrary"),
            vmem_limit_bytes=48 * 1024 * 1024,
        ),
    )(x)

    inv_b = 1.0 / float(B)                    # true (unpadded) batch size
    flops = jnp.sum(reg_parts) * jnp.float32(inv_b * inv_b)
    nnz_per_row = jnp.sum(nnz_parts) * jnp.float32(inv_b)
    return flops, nnz_per_row


@jax.jit
def _forward_core(q, d, q_weight, d_weight):
    """Both pallas_calls live in one jitted program; weights are traced scalars."""
    q_flops, q_nnz = _reg_stats(q)
    d_flops, d_nnz = _reg_stats(d)
    q_reg = q_flops * q_weight
    d_reg = d_flops * d_weight
    return q_reg + d_reg, q_reg, d_reg, q_nnz, d_nnz


class RegularizationLoss:
    """JAX/Pallas port of rankers' RegularizationLoss (FLOPS reg)."""

    name = "regularization"

    def __init__(self, q_weight=0.08, d_weight=0.1, t=0, T=1000,
                 reduction: str = "mean") -> None:
        self.q_weight = q_weight
        self.d_weight = d_weight
        self.t = t
        self.T = T
        self.reduction = reduction

    # Scheduler steps: identical (compounding) semantics to the torch module.
    def step_q(self):
        if self.t >= self.T:
            pass
        else:
            self.t += 1
            self.q_weight = self.q_weight * (self.t / self.T) ** 2

    def step_d(self):
        if self.t >= self.T:
            pass
        else:
            self.t += 1
            self.d_weight = self.d_weight * (self.t / self.T) ** 2

    def step(self):
        if self.t >= self.T:
            pass
        else:
            self.t += 1
            self.q_weight = self.q_weight * (self.t / self.T) ** 2
            self.d_weight = self.d_weight * (self.t / self.T) ** 2

    def reg(self, reps, weight=0.0):
        flops, _ = _reg_stats(reps)
        return flops * jnp.float32(weight)

    def num_non_zero(self, reps):
        # NOTE: (x > 0) matches torch num_non_zero exactly (negatives/zeros not
        # counted) — correct for post-ReLU SPLADE reps.
        _, nnz = _reg_stats(reps)
        return nnz

    def forward(self, query_hidden_states, text_hidden_states, **kwargs):
        # Weights are passed as traced scalars so the jitted program neither
        # retraces nor freezes them as the scheduler updates them every step.
        total, q_reg, d_reg, q_nnz, d_nnz = _forward_core(
            query_hidden_states, text_hidden_states,
            jnp.float32(self.q_weight), jnp.float32(self.d_weight))
        self.step()
        to_log = {
            "q_reg": q_reg,
            "d_reg": d_reg,
            "q_num_non_zeo": q_nnz,
            "d_num_non_zeo": d_nnz,
        }
        return total, to_log

    __call__ = forward


if __name__ == "__main__":
    key = jax.random.PRNGKey(0)
    kq, kd, kx, ky = jax.random.split(key, 4)

    # small sparse-ish hidden states (post-ReLU SPLADE-style reps)
    q = jax.nn.relu(jax.random.normal(kq, (2, 256), dtype=jnp.float32) - 0.5)
    d = jax.nn.relu(jax.random.normal(kd, (4, 256), dtype=jnp.float32) - 0.5)

    loss_fn = RegularizationLoss(q_weight=0.08, d_weight=0.1)
    total, to_log = loss_fn(q, d)
    jax.block_until_ready(total)
    for v in to_log.values():
        jax.block_until_ready(v)

    # plain-JAX references
    def ref_reg(x, w):
        xf = x.astype(jnp.float32)
        return jnp.sum(jnp.mean(jnp.abs(xf), axis=0) ** 2) * w

    def ref_nnz(x):
        return jnp.mean(jnp.sum((x > 0).astype(jnp.float32), axis=1))

    ref_total = ref_reg(q, 0.08) + ref_reg(d, 0.1)
    assert jnp.allclose(total, ref_total, rtol=1e-5, atol=1e-6)
    assert jnp.allclose(to_log["q_reg"], ref_reg(q, 0.08), rtol=1e-5, atol=1e-6)
    assert jnp.allclose(to_log["d_reg"], ref_reg(d, 0.1), rtol=1e-5, atol=1e-6)
    assert jnp.allclose(to_log["q_num_non_zeo"], ref_nnz(q), rtol=1e-6)
    assert jnp.allclose(to_log["d_num_non_zeo"], ref_nnz(d), rtol=1e-6)

    # exact-tile (unmasked fast-path) case: B % tile_b == 0, V % tile_v == 0
    y = jax.nn.relu(jax.random.normal(ky, (8, 256), dtype=jnp.float32) - 0.4)
    flops_y, nnz_y = _reg_stats(y)
    jax.block_until_ready(flops_y)
    assert jnp.allclose(flops_y, ref_reg(y, 1.0), rtol=1e-5, atol=1e-6)
    assert jnp.allclose(nnz_y, ref_nnz(y), rtol=1e-6)

    # ragged multi-tile path (in-kernel edge masking on both axes, grid 3x3)
    x = jax.nn.relu(jax.random.normal(kx, (20, 300), dtype=jnp.float32) - 0.3)
    flops, nnz = _reg_stats(x, tile_v=128, tile_b=8)
    jax.block_until_ready(flops)
    assert jnp.allclose(flops, ref_reg(x, 1.0), rtol=1e-5, atol=1e-6)
    assert jnp.allclose(nnz, ref_nnz(x), rtol=1e-6)

    # bf16 reps: streamed in native dtype (abs / compare stay packed bf16),
    # block larger than the array in both dims -> masked single tile
    xb = x.astype(jnp.bfloat16)
    flops_b, nnz_b = _reg_stats(xb)
    jax.block_until_ready(flops_b)
    assert jnp.allclose(flops_b, ref_reg(xb, 1.0), rtol=1e-5, atol=1e-6)
    assert jnp.allclose(nnz_b, ref_nnz(xb), rtol=1e-6)

    print("KERNEL_OK")
</pallas_src>

<mosaic_0001>
module attributes {stable_mosaic.version = 11 : i64} {
  func.func @kernel(%arg0: i32, %arg1: i32, %arg2: memref<8x256xf32, #tpu.memory_space<vmem>>, %arg3: memref<1x256xf32, #tpu.memory_space<vmem>>, %arg4: memref<1x256xf32, #tpu.memory_space<vmem>>, %arg5: memref<8x256xf32, #tpu.memory_space<vmem>>, %arg6: memref<8x256xf32, #tpu.memory_space<vmem>>) attributes {dimension_semantics = [#tpu.dimension_semantics<parallel>, #tpu.dimension_semantics<arbitrary>], iteration_bounds = array<i64: 1, 1>, scalar_prefetch = 0 : i64, scratch_operands = 2 : i64, tpu.core_type = #tpu.core_type<tc>, window_params = [{transform_indices = @transform_0, window_bounds = array<i64: 8, 256>}, {transform_indices = @transform_1, window_bounds = array<i64: 1, 256>}, {transform_indices = @transform_2, window_bounds = array<i64: 1, 256>}]} {
    %c0_i32 = arith.constant 0 : i32
    %0 = arith.cmpi eq, %arg1, %c0_i32 : i32
    %1 = arith.extui %0 : i1 to i32
    %c0_i32_0 = arith.constant 0 : i32
    %2 = arith.cmpi ne, %1, %c0_i32_0 : i32
    scf.if %2 {
      %cst = arith.constant 0.000000e+00 : f32
      %12 = vector.broadcast %cst : f32 to vector<8x256xf32>
      %c0 = arith.constant 0 : index
      %c0_6 = arith.constant 0 : index
      %13 = vector.load %arg5[%c0, %c0_6] : memref<8x256xf32, #tpu.memory_space<vmem>>, vector<8x256xf32>
      tpu.vector_store %arg5[%c0, %c0_6], %12 {strides = array<i32>} : memref<8x256xf32, #tpu.memory_space<vmem>>, vector<8x256xf32>,
      %cst_7 = arith.constant 0.000000e+00 : f32
      %14 = vector.broadcast %cst_7 : f32 to vector<8x256xf32>
      %c0_8 = arith.constant 0 : index
      %c0_9 = arith.constant 0 : index
      %15 = vector.load %arg6[%c0_8, %c0_9] : memref<8x256xf32, #tpu.memory_space<vmem>>, vector<8x256xf32>
      tpu.vector_store %arg6[%c0_8, %c0_9], %14 {strides = array<i32>} : memref<8x256xf32, #tpu.memory_space<vmem>>, vector<8x256xf32>,
    } else {
    }
    %c0_i32_1 = arith.constant 0 : i32
    %3 = arith.cmpi eq, %arg1, %c0_i32_1 : i32
    %true = arith.constant true
    %4 = arith.xori %3, %true : i1
    %5 = arith.extui %4 : i1 to i32
    %c0_i32_2 = arith.constant 0 : i32
    %6 = arith.cmpi ne, %5, %c0_i32_2 : i32
    scf.if %6 {
      %c0 = arith.constant 0 : index
      %c0_6 = arith.constant 0 : index
      %12 = vector.load %arg2[%c0, %c0_6] : memref<8x256xf32, #tpu.memory_space<vmem>>, vector<8x256xf32>
      %13 = math.absf %12 : vector<8x256xf32>
      %cst = arith.constant 0.000000e+00 : f32
      %14 = vector.broadcast %cst : f32 to vector<8x256xf32>
      %15 = arith.cmpf ogt, %12, %14 : vector<8x256xf32>
      %16 = vector.shape_cast %13 : vector<8x256xf32> to vector<1x8x256xf32>
      %17 = arith.extui %15 : vector<8x256xi1> to vector<8x256xi32>
      %18 = arith.sitofp %17 : vector<8x256xi32> to vector<8x256xf32>
      %19 = vector.shape_cast %18 : vector<8x256xf32> to vector<1x8x256xf32>
      %c0_7 = arith.constant 0 : index
      %c0_8 = arith.constant 0 : index
      %20 = vector.load %arg5[%c0_7, %c0_8] : memref<8x256xf32, #tpu.memory_space<vmem>>, vector<8x256xf32>
      %cst_9 = arith.constant dense<0.000000e+00> : vector<8x256xf32>
      %21 = vector.multi_reduction <add>, %16, %cst_9 [0] : vector<1x8x256xf32> to vector<8x256xf32>
      %22 = arith.addf %20, %21 : vector<8x256xf32>
      %c0_10 = arith.constant 0 : index
      %c0_11 = arith.constant 0 : index
      %23 = vector.load %arg5[%c0_10, %c0_11] : memref<8x256xf32, #tpu.memory_space<vmem>>, vector<8x256xf32>
      tpu.vector_store %arg5[%c0_10, %c0_11], %22 {strides = array<i32>} : memref<8x256xf32, #tpu.memory_space<vmem>>, vector<8x256xf32>,
      %c0_12 = arith.constant 0 : index
      %c0_13 = arith.constant 0 : index
      %24 = vector.load %arg6[%c0_12, %c0_13] : memref<8x256xf32, #tpu.memory_space<vmem>>, vector<8x256xf32>
      %cst_14 = arith.constant dense<0.000000e+00> : vector<8x256xf32>
      %25 = vector.multi_reduction <add>, %19, %cst_14 [0] : vector<1x8x256xf32> to vector<8x256xf32>
      %26 = arith.addf %24, %25 : vector<8x256xf32>
      %c0_15 = arith.constant 0 : index
      %c0_16 = arith.constant 0 : index
      %27 = vector.load %arg6[%c0_15, %c0_16] : memref<8x256xf32, #tpu.memory_space<vmem>>, vector<8x256xf32>
      tpu.vector_store %arg6[%c0_15, %c0_16], %26 {strides = array<i32>} : memref<8x256xf32, #tpu.memory_space<vmem>>, vector<8x256xf32>,
    } else {
    }
    %7 = arith.extui %3 : i1 to i32
    %c0_i32_3 = arith.constant 0 : i32
    %8 = arith.cmpi ne, %7, %c0_i32_3 : i32
    scf.if %8 {
      %c8_i32 = arith.constant 8 : i32
      %12 = arith.muli %arg1, %c8_i32 : i32
      %c2_i32 = arith.constant 2 : i32
      %13 = arith.subi %c2_i32, %12 : i32
      %c256_i32 = arith.constant 256 : i32
      %14 = arith.muli %arg0, %c256_i32 : i32
      %c256_i32_6 = arith.constant 256 : i32
      %15 = arith.subi %c256_i32_6, %14 : i32
      %16 = tpu.iota {dimensions = array<i32: 0>} : vector<8x1xi32>
      %17 = vector.broadcast %13 : i32 to vector<8x1xi32>
      %18 = arith.cmpi slt, %16, %17 : vector<8x1xi32>
      %19 = tpu.iota {dimensions = array<i32: 1>} : vector<1x256xi32>
      %20 = vector.broadcast %15 : i32 to vector<1x256xi32>
      %21 = arith.cmpi slt, %19, %20 : vector<1x256xi32>
      %22 = vector.broadcast %18 : vector<8x1xi1> to vector<8x256xi1>
      %23 = vector.broadcast %21 : vector<1x256xi1> to vector<8x256xi1>
      %24 = arith.andi %22, %23 : vector<8x256xi1>
      %c0 = arith.constant 0 : index
      %c0_7 = arith.constant 0 : index
      %25 = vector.load %arg2[%c0, %c0_7] : memref<8x256xf32, #tpu.memory_space<vmem>>, vector<8x256xf32>
      %26 = math.absf %25 : vector<8x256xf32>
      %cst = arith.constant 0.000000e+00 : f32
      %27 = vector.broadcast %cst : f32 to vector<8x256xf32>
      %28 = arith.cmpf ogt, %25, %27 : vector<8x256xf32>
      %c0_i32_8 = arith.constant 0 : i32
      %29 = arith.sitofp %c0_i32_8 : i32 to f32
      %30 = vector.broadcast %29 : f32 to vector<8x256xf32>
      %31 = arith.select %24, %26, %30 : vector<8x256xi1>, vector<8x256xf32>
      %32 = arith.andi %28, %24 : vector<8x256xi1>
      %33 = vector.shape_cast %31 : vector<8x256xf32> to vector<1x8x256xf32>
      %34 = arith.extui %32 : vector<8x256xi1> to vector<8x256xi32>
      %35 = arith.sitofp %34 : vector<8x256xi32> to vector<8x256xf32>
      %36 = vector.shape_cast %35 : vector<8x256xf32> to vector<1x8x256xf32>
      %c0_9 = arith.constant 0 : index
      %c0_10 = arith.constant 0 : index
      %37 = vector.load %arg5[%c0_9, %c0_10] : memref<8x256xf32, #tpu.memory_space<vmem>>, vector<8x256xf32>
      %cst_11 = arith.constant dense<0.000000e+00> : vector<8x256xf32>
      %38 = vector.multi_reduction <add>, %33, %cst_11 [0] : vector<1x8x256xf32> to vector<8x256xf32>
      %39 = arith.addf %37, %38 : vector<8x256xf32>
      %c0_12 = arith.constant 0 : index
      %c0_13 = arith.constant 0 : index
      %40 = vector.load %arg5[%c0_12, %c0_13] : memref<8x256xf32, #tpu.memory_space<vmem>>, vector<8x256xf32>
      tpu.vector_store %arg5[%c0_12, %c0_13], %39 {strides = array<i32>} : memref<8x256xf32, #tpu.memory_space<vmem>>, vector<8x256xf32>,
      %c0_14 = arith.constant 0 : index
      %c0_15 = arith.constant 0 : index
      %41 = vector.load %arg6[%c0_14, %c0_15] : memref<8x256xf32, #tpu.memory_space<vmem>>, vector<8x256xf32>
      %cst_16 = arith.constant dense<0.000000e+00> : vector<8x256xf32>
      %42 = vector.multi_reduction <add>, %36, %cst_16 [0] : vector<1x8x256xf32> to vector<8x256xf32>
      %43 = arith.addf %41, %42 : vector<8x256xf32>
      %c0_17 = arith.constant 0 : index
      %c0_18 = arith.constant 0 : index
      %44 = vector.load %arg6[%c0_17, %c0_18] : memref<8x256xf32, #tpu.memory_space<vmem>>, vector<8x256xf32>
      tpu.vector_store %arg6[%c0_17, %c0_18], %43 {strides = array<i32>} : memref<8x256xf32, #tpu.memory_space<vmem>>, vector<8x256xf32>,
    } else {
    }
    %c0_i32_4 = arith.constant 0 : i32
    %9 = arith.cmpi eq, %arg1, %c0_i32_4 : i32
    %10 = arith.extui %9 : i1 to i32
    %c0_i32_5 = arith.constant 0 : i32
    %11 = arith.cmpi ne, %10, %c0_i32_5 : i32
    scf.if %11 {
      %c0 = arith.constant 0 : index
      %c0_6 = arith.constant 0 : index
      %12 = vector.load %arg5[%c0, %c0_6] : memref<8x256xf32, #tpu.memory_space<vmem>>, vector<8x256xf32>
      %cst = arith.constant dense<0.000000e+00> : vector<256xf32>
      %13 = vector.multi_reduction <add>, %12, %cst [0] : vector<8x256xf32> to vector<256xf32>
      %14 = vector.shape_cast %13 : vector<256xf32> to vector<1x256xf32>
      %15 = arith.mulf %14, %14 : vector<1x256xf32>
      %c0_7 = arith.constant 0 : index
      %c0_8 = arith.constant 0 : index
      %16 = vector.load %arg3[%c0_7, %c0_8] : memref<1x256xf32, #tpu.memory_space<vmem>>, vector<1x256xf32>
      tpu.vector_store %arg3[%c0_7, %c0_8], %15 {strides = array<i32>} : memref<1x256xf32, #tpu.memory_space<vmem>>, vector<1x256xf32>,
      %c0_9 = arith.constant 0 : index
      %c0_10 = arith.constant 0 : index
      %17 = vector.load %arg6[%c0_9, %c0_10] : memref<8x256xf32, #tpu.memory_space<vmem>>, vector<8x256xf32>
      %cst_11 = arith.constant dense<0.000000e+00> : vector<256xf32>
      %18 = vector.multi_reduction <add>, %17, %cst_11 [0] : vector<8x256xf32> to vector<256xf32>
      %19 = vector.shape_cast %18 : vector<256xf32> to vector<1x256xf32>
      %c0_12 = arith.constant 0 : index
      %c0_13 = arith.constant 0 : index
      %20 = vector.load %arg4[%c0_12, %c0_13] : memref<1x256xf32, #tpu.memory_space<vmem>>, vector<1x256xf32>
      tpu.vector_store %arg4[%c0_12, %c0_13], %19 {strides = array<i32>} : memref<1x256xf32, #tpu.memory_space<vmem>>, vector<1x256xf32>,
    } else {
    }
    return
  }
  func.func @transform_0(%arg0: i32, %arg1: i32) -> (i32, i32) {
    %c0_i32 = arith.constant 0 : i32
    return %arg1, %arg0 : i32, i32
  }
  func.func @transform_1(%arg0: i32, %arg1: i32) -> (i32, i32) {
    %c0_i32 = arith.constant 0 : i32
    %c0_i32_0 = arith.constant 0 : i32
    return %c0_i32, %arg0 : i32, i32
  }
  func.func @transform_2(%arg0: i32, %arg1: i32) -> (i32, i32) {
    %c0_i32 = arith.constant 0 : i32
    %c0_i32_0 = arith.constant 0 : i32
    return %c0_i32, %arg0 : i32, i32
  }
}

module attributes {stable_mosaic.version = 11 : i64} {
  func.func @kernel(%arg0: i32, %arg1: i32, %arg2: memref<8x256xf32, #tpu.memory_space<vmem>>, %arg3: memref<1x256xf32, #tpu.memory_space<vmem>>, %arg4: memref<1x256xf32, #tpu.memory_space<vmem>>, %arg5: memref<8x256xf32, #tpu.memory_space<vmem>>, %arg6: memref<8x256xf32, #tpu.memory_space<vmem>>) attributes {dimension_semantics = [#tpu.dimension_semantics<parallel>, #tpu.dimension_semantics<arbitrary>], iteration_bounds = array<i64: 1, 1>, scalar_prefetch = 0 : i64, scratch_operands = 2 : i64, tpu.core_type = #tpu.core_type<tc>, window_params = [{transform_indices = @transform_0, window_bounds = array<i64: 8, 256>}, {transform_indices = @transform_1, window_bounds = array<i64: 1, 256>}, {transform_indices = @transform_2, window_bounds = array<i64: 1, 256>}]} {
    %c0_i32 = arith.constant 0 : i32
    %0 = arith.cmpi eq, %arg1, %c0_i32 : i32
    %1 = arith.extui %0 : i1 to i32
    %c0_i32_0 = arith.constant 0 : i32
    %2 = arith.cmpi ne, %1, %c0_i32_0 : i32
    scf.if %2 {
      %cst = arith.constant 0.000000e+00 : f32
      %12 = vector.broadcast %cst : f32 to vector<8x256xf32>
      %c0 = arith.constant 0 : index
      %c0_6 = arith.constant 0 : index
      %13 = vector.load %arg5[%c0, %c0_6] : memref<8x256xf32, #tpu.memory_space<vmem>>, vector<8x256xf32>
      tpu.vector_store %arg5[%c0, %c0_6], %12 {strides = array<i32>} : memref<8x256xf32, #tpu.memory_space<vmem>>, vector<8x256xf32>,
      %cst_7 = arith.constant 0.000000e+00 : f32
      %14 = vector.broadcast %cst_7 : f32 to vector<8x256xf32>
      %c0_8 = arith.constant 0 : index
      %c0_9 = arith.constant 0 : index
      %15 = vector.load %arg6[%c0_8, %c0_9] : memref<8x256xf32, #tpu.memory_space<vmem>>, vector<8x256xf32>
      tpu.vector_store %arg6[%c0_8, %c0_9], %14 {strides = array<i32>} : memref<8x256xf32, #tpu.memory_space<vmem>>, vector<8x256xf32>,
    } else {
    }
    %c0_i32_1 = arith.constant 0 : i32
    %3 = arith.cmpi eq, %arg1, %c0_i32_1 : i32
    %true = arith.constant true
    %4 = arith.xori %3, %true : i1
    %5 = arith.extui %4 : i1 to i32
    %c0_i32_2 = arith.constant 0 : i32
    %6 = arith.cmpi ne, %5, %c0_i32_2 : i32
    scf.if %6 {
      %c0 = arith.constant 0 : index
      %c0_6 = arith.constant 0 : index
      %12 = vector.load %arg2[%c0, %c0_6] : memref<8x256xf32, #tpu.memory_space<vmem>>, vector<8x256xf32>
      %13 = math.absf %12 : vector<8x256xf32>
      %cst = arith.constant 0.000000e+00 : f32
      %14 = vector.broadcast %cst : f32 to vector<8x256xf32>
      %15 = arith.cmpf ogt, %12, %14 : vector<8x256xf32>
      %16 = vector.shape_cast %13 : vector<8x256xf32> to vector<1x8x256xf32>
      %17 = arith.extui %15 : vector<8x256xi1> to vector<8x256xi32>
      %18 = arith.sitofp %17 : vector<8x256xi32> to vector<8x256xf32>
      %19 = vector.shape_cast %18 : vector<8x256xf32> to vector<1x8x256xf32>
      %c0_7 = arith.constant 0 : index
      %c0_8 = arith.constant 0 : index
      %20 = vector.load %arg5[%c0_7, %c0_8] : memref<8x256xf32, #tpu.memory_space<vmem>>, vector<8x256xf32>
      %cst_9 = arith.constant dense<0.000000e+00> : vector<8x256xf32>
      %21 = vector.multi_reduction <add>, %16, %cst_9 [0] : vector<1x8x256xf32> to vector<8x256xf32>
      %22 = arith.addf %20, %21 : vector<8x256xf32>
      %c0_10 = arith.constant 0 : index
      %c0_11 = arith.constant 0 : index
      %23 = vector.load %arg5[%c0_10, %c0_11] : memref<8x256xf32, #tpu.memory_space<vmem>>, vector<8x256xf32>
      tpu.vector_store %arg5[%c0_10, %c0_11], %22 {strides = array<i32>} : memref<8x256xf32, #tpu.memory_space<vmem>>, vector<8x256xf32>,
      %c0_12 = arith.constant 0 : index
      %c0_13 = arith.constant 0 : index
      %24 = vector.load %arg6[%c0_12, %c0_13] : memref<8x256xf32, #tpu.memory_space<vmem>>, vector<8x256xf32>
      %cst_14 = arith.constant dense<0.000000e+00> : vector<8x256xf32>
      %25 = vector.multi_reduction <add>, %19, %cst_14 [0] : vector<1x8x256xf32> to vector<8x256xf32>
      %26 = arith.addf %24, %25 : vector<8x256xf32>
      %c0_15 = arith.constant 0 : index
      %c0_16 = arith.constant 0 : index
      %27 = vector.load %arg6[%c0_15, %c0_16] : memref<8x256xf32, #tpu.memory_space<vmem>>, vector<8x256xf32>
      tpu.vector_store %arg6[%c0_15, %c0_16], %26 {strides = array<i32>} : memref<8x256xf32, #tpu.memory_space<vmem>>, vector<8x256xf32>,
    } else {
    }
    %7 = arith.extui %3 : i1 to i32
    %c0_i32_3 = arith.constant 0 : i32
    %8 = arith.cmpi ne, %7, %c0_i32_3 : i32
    scf.if %8 {
      %c8_i32 = arith.constant 8 : i32
      %12 = arith.muli %arg1, %c8_i32 : i32
      %c4_i32 = arith.constant 4 : i32
      %13 = arith.subi %c4_i32, %12 : i32
      %c256_i32 = arith.constant 256 : i32
      %14 = arith.muli %arg0, %c256_i32 : i32
      %c256_i32_6 = arith.constant 256 : i32
      %15 = arith.subi %c256_i32_6, %14 : i32
      %16 = tpu.iota {dimensions = array<i32: 0>} : vector<8x1xi32>
      %17 = vector.broadcast %13 : i32 to vector<8x1xi32>
      %18 = arith.cmpi slt, %16, %17 : vector<8x1xi32>
      %19 = tpu.iota {dimensions = array<i32: 1>} : vector<1x256xi32>
      %20 = vector.broadcast %15 : i32 to vector<1x256xi32>
      %21 = arith.cmpi slt, %19, %20 : vector<1x256xi32>
      %22 = vector.broadcast %18 : vector<8x1xi1> to vector<8x256xi1>
      %23 = vector.broadcast %21 : vector<1x256xi1> to vector<8x256xi1>
      %24 = arith.andi %22, %23 : vector<8x256xi1>
      %c0 = arith.constant 0 : index
      %c0_7 = arith.constant 0 : index
      %25 = vector.load %arg2[%c0, %c0_7] : memref<8x256xf32, #tpu.memory_space<vmem>>, vector<8x256xf32>
      %26 = math.absf %25 : vector<8x256xf32>
      %cst = arith.constant 0.000000e+00 : f32
      %27 = vector.broadcast %cst : f32 to vector<8x256xf32>
      %28 = arith.cmpf ogt, %25, %27 : vector<8x256xf32>
      %c0_i32_8 = arith.constant 0 : i32
      %29 = arith.sitofp %c0_i32_8 : i32 to f32
      %30 = vector.broadcast %29 : f32 to vector<8x256xf32>
      %31 = arith.select %24, %26, %30 : vector<8x256xi1>, vector<8x256xf32>
      %32 = arith.andi %28, %24 : vector<8x256xi1>
      %33 = vector.shape_cast %31 : vector<8x256xf32> to vector<1x8x256xf32>
      %34 = arith.extui %32 : vector<8x256xi1> to vector<8x256xi32>
      %35 = arith.sitofp %34 : vector<8x256xi32> to vector<8x256xf32>
      %36 = vector.shape_cast %35 : vector<8x256xf32> to vector<1x8x256xf32>
      %c0_9 = arith.constant 0 : index
      %c0_10 = arith.constant 0 : index
      %37 = vector.load %arg5[%c0_9, %c0_10] : memref<8x256xf32, #tpu.memory_space<vmem>>, vector<8x256xf32>
      %cst_11 = arith.constant dense<0.000000e+00> : vector<8x256xf32>
      %38 = vector.multi_reduction <add>, %33, %cst_11 [0] : vector<1x8x256xf32> to vector<8x256xf32>
      %39 = arith.addf %37, %38 : vector<8x256xf32>
      %c0_12 = arith.constant 0 : index
      %c0_13 = arith.constant 0 : index
      %40 = vector.load %arg5[%c0_12, %c0_13] : memref<8x256xf32, #tpu.memory_space<vmem>>, vector<8x256xf32>
      tpu.vector_store %arg5[%c0_12, %c0_13], %39 {strides = array<i32>} : memref<8x256xf32, #tpu.memory_space<vmem>>, vector<8x256xf32>,
      %c0_14 = arith.constant 0 : index
      %c0_15 = arith.constant 0 : index
      %41 = vector.load %arg6[%c0_14, %c0_15] : memref<8x256xf32, #tpu.memory_space<vmem>>, vector<8x256xf32>
      %cst_16 = arith.constant dense<0.000000e+00> : vector<8x256xf32>
      %42 = vector.multi_reduction <add>, %36, %cst_16 [0] : vector<1x8x256xf32> to vector<8x256xf32>
      %43 = arith.addf %41, %42 : vector<8x256xf32>
      %c0_17 = arith.constant 0 : index
      %c0_18 = arith.constant 0 : index
      %44 = vector.load %arg6[%c0_17, %c0_18] : memref<8x256xf32, #tpu.memory_space<vmem>>, vector<8x256xf32>
      tpu.vector_store %arg6[%c0_17, %c0_18], %43 {strides = array<i32>} : memref<8x256xf32, #tpu.memory_space<vmem>>, vector<8x256xf32>,
    } else {
    }
    %c0_i32_4 = arith.constant 0 : i32
    %9 = arith.cmpi eq, %arg1, %c0_i32_4 : i32
    %10 = arith.extui %9 : i1 to i32
    %c0_i32_5 = arith.constant 0 : i32
    %11 = arith.cmpi ne, %10, %c0_i32_5 : i32
    scf.if %11 {
      %c0 = arith.constant 0 : index
      %c0_6 = arith.constant 0 : index
      %12 = vector.load %arg5[%c0, %c0_6] : memref<8x256xf32, #tpu.memory_space<vmem>>, vector<8x256xf32>
      %cst = arith.constant dense<0.000000e+00> : vector<256xf32>
      %13 = vector.multi_reduction <add>, %12, %cst [0] : vector<8x256xf32> to vector<256xf32>
      %14 = vector.shape_cast %13 : vector<256xf32> to vector<1x256xf32>
      %15 = arith.mulf %14, %14 : vector<1x256xf32>
      %c0_7 = arith.constant 0 : index
      %c0_8 = arith.constant 0 : index
      %16 = vector.load %arg3[%c0_7, %c0_8] : memref<1x256xf32, #tpu.memory_space<vmem>>, vector<1x256xf32>
      tpu.vector_store %arg3[%c0_7, %c0_8], %15 {strides = array<i32>} : memref<1x256xf32, #tpu.memory_space<vmem>>, vector<1x256xf32>,
      %c0_9 = arith.constant 0 : index
      %c0_10 = arith.constant 0 : index
      %17 = vector.load %arg6[%c0_9, %c0_10] : memref<8x256xf32, #tpu.memory_space<vmem>>, vector<8x256xf32>
      %cst_11 = arith.constant dense<0.000000e+00> : vector<256xf32>
      %18 = vector.multi_reduction <add>, %17, %cst_11 [0] : vector<8x256xf32> to vector<256xf32>
      %19 = vector.shape_cast %18 : vector<256xf32> to vector<1x256xf32>
      %c0_12 = arith.constant 0 : index
      %c0_13 = arith.constant 0 : index
      %20 = vector.load %arg4[%c0_12, %c0_13] : memref<1x256xf32, #tpu.memory_space<vmem>>, vector<1x256xf32>
      tpu.vector_store %arg4[%c0_12, %c0_13], %19 {strides = array<i32>} : memref<1x256xf32, #tpu.memory_space<vmem>>, vector<1x256xf32>,
    } else {
    }
    return
  }
  func.func @transform_0(%arg0: i32, %arg1: i32) -> (i32, i32) {
    %c0_i32 = arith.constant 0 : i32
    return %arg1, %arg0 : i32, i32
  }
  func.func @transform_1(%arg0: i32, %arg1: i32) -> (i32, i32) {
    %c0_i32 = arith.constant 0 : i32
    %c0_i32_0 = arith.constant 0 : i32
    return %c0_i32, %arg0 : i32, i32
  }
  func.func @transform_2(%arg0: i32, %arg1: i32) -> (i32, i32) {
    %c0_i32 = arith.constant 0 : i32
    %c0_i32_0 = arith.constant 0 : i32
    return %c0_i32, %arg0 : i32, i32
  }
}

</mosaic_0001>

<bundles_post_ra>
// kernel: _forward_core.3
= control target key start
LH: loop header
LB: loop body
LE: loop exit
PB: predicated region body
PF: predicated region fallthrough
CT: control target
= control target key end

     0   :  { %v67_v0 = vlaneseq  ;;  %v220_v8 = vmov 0   ;;  %v221_v18 = vmov 0.0   ;;  %v222_v23 = vmov 1966171168   ;;  %s250_s0 = inlined_call_operand.vmem [shape: f32[4,256], index: 0, kind: input, shape index: {}]   ;;  %s251_s1 = inlined_call_operand.vmem [shape: f32[1,256], index: 1, kind: output, shape index: {0}]   ;;  %s252_s2 = inlined_call_operand.vmem [shape: f32[1,256], index: 2, kind: output, shape index: {1}]  }
   0x1   :  { %v85_v1 = vld [vmem:[%s250_s0] sm:$0xff]  ;;  %v86_v2 = vld [vmem:[%s250_s0 + $0x8] sm:$0xff]  ;;  %v153_v24 = vunpack.c.l.s4 %v222_v23 }
   0x2   :  { %v68_v3 = vshrl.u32 %v67_v0, 7  ;;  %v87_v4 = vand.u32 2147483647, %v85_v1  ;;  %v88_v5 = vand.u32 2147483647, %v86_v2  ;;  %vm89_vm1 = vcmp.gt.f32.partialorder %v85_v1, 0.0 }
   0x3   :  { %vm90_vm2 = vcmp.gt.f32.partialorder %v86_v2, 0.0  ;;  %v154_v33 = vunpack.c.0.s8 %v153_v24  ;;  %vm169_vm7 = vcmp.lt.s32.totalorder %v67_v0, 256 }
   0x4   :  { %vm70_vm0 = vcmp.lt.s32.totalorder %v68_v3, 4  ;;  %v93_v6 = vcombine.low %v87_v4, %v88_v5  ;;  %v94_v7 = vcombine.high %v87_v4, %v88_v5 }
   0x5   :  { %v99_v9 = vsel %vm70_vm0, 1, %v220_v8  ;;  %v157_v42 = vsub.s32 %v154_v33, %v68_v3 }
   0x6   :  { %v97_v10 = vsel %vm70_vm0, %v93_v6, 0.0  ;;  %v98_v11 = vsel %vm70_vm0, %v94_v7, 0.0  ;;  %v101_v12 = vcombine.low %v99_v9, %v99_v9  ;;  %v102_v13 = vcombine.high %v99_v9, %v99_v9 }
   0x7   :  { %v135_v14 = vrot.slane %v97_v10, 4  ;;  %v141_v15 = vrot.slane %v98_v11, 4 }
   0x8   :  { %vm103_vm3 = vcmp.ne.s32.totalorder %v101_v12, 0  ;;  %vm104_vm4 = vcmp.ne.s32.totalorder %v102_v13, 0 }
   0x9   :  { %vm105_vm5 = vmand %vm89_vm1, %vm103_vm3  ;;  %v136_v16 = vadd.f32 %v135_v14, %v97_v10  ;;  %v142_v17 = vadd.f32 %v141_v15, %v98_v11 }
   0xa   :  { %vm106_vm6 = vmand %vm90_vm2, %vm104_vm4  ;;  %v215_v19 = vsel %vm105_vm5, 1.0, %v221_v18 }
   0xb   :  { %v216_v20 = vsel %vm106_vm6, 1.0, %v221_v18  ;;  %v137_v21 = vrot.slane %v136_v16, 2  ;;  %v143_v22 = vrot.slane %v142_v17, 2 }
   0xc   :  { %v125_v25 = vcombine.low %v215_v19, %v216_v20  ;;  %v126_v26 = vcombine.high %v215_v19, %v216_v20 }
   0xd   :  { %v138_v27 = vadd.f32 %v137_v21, %v136_v16  ;;  %v144_v28 = vadd.f32 %v143_v22, %v142_v17 }
   0xe   :  { %v174_v29 = vrot.slane %v125_v25, 4  ;;  %v180_v30 = vrot.slane %v126_v26, 4 }
   0xf   :  { %v139_v31 = vrot.slane %v138_v27, 1  ;;  %v145_v32 = vrot.slane %v144_v28, 1 }
  0x10   :  { %v175_v34 = vadd.f32 %v174_v29, %v125_v25  ;;  %v181_v35 = vadd.f32 %v180_v30, %v126_v26 }
  0x11   :  { %v140_v36 = vadd.f32 %v139_v31, %v138_v27  ;;  %v146_v37 = vadd.f32 %v145_v32, %v144_v28 }
  0x12   :  { %v176_v38 = vrot.slane %v175_v34, 2  ;;  %v182_v39 = vrot.slane %v181_v35, 2 }
  0x13   :  { %v147_v40 = vmul.f32 %v140_v36, %v140_v36  ;;  %v148_v41 = vmul.f32 %v146_v37, %v146_v37 }
  0x14   :  { %v177_v43 = vadd.f32 %v176_v38, %v175_v34  ;;  %v183_v44 = vadd.f32 %v182_v39, %v181_v35 }
  0x15   :  { %v151_v45 = vcombine.low %v147_v40, %v148_v41 }
  0x16   :  { %v178_v46 = vrot.slane %v177_v43, 1  ;;  %v184_v47 = vrot.slane %v183_v44, 1 }
  0x17   :  { %v158_v48 = vrot.slane %v151_v45, %v157_v42 }
  0x18   :  { %v179_v49 = vadd.f32 %v178_v46, %v177_v43  ;;  %v185_v50 = vadd.f32 %v184_v47, %v183_v44 }
  0x19   :  { %v165_v51 = vrot.slane %v158_v48, %v157_v42 }
  0x1a   :  { %v188_v52 = vcombine.low %v179_v49, %v185_v50 }
  0x1b   :  { %171 = vst.msk [vmem:[%s251_s1] sm:$0x3] %vm169_vm7, %v165_v51 }
  0x1c   :  { %v195_v53 = vrot.slane %v188_v52, %v157_v42 }
  0x1e   :  { %v202_v54 = vrot.slane %v195_v53, %v157_v42 }
  0x20   :  { %204 = vst.msk [vmem:[%s252_s2] sm:$0x3] %vm169_vm7, %v202_v54 }

// kernel: _forward_core.2
= control target key start
LH: loop header
LB: loop body
LE: loop exit
PB: predicated region body
PF: predicated region fallthrough
CT: control target
= control target key end

     0   :  { %v117_v0 = vlaneseq  ;;  %v343_v4 = vmov 1983009808   ;;  %v344_v16 = vmov 0   ;;  %v345_v30 = vmov 0.0   ;;  %s394_s0 = inlined_call_operand.vmem [shape: f32[2,256], index: 0, kind: input, shape index: {}]   ;;  %s395_s1 = inlined_call_operand.vmem [shape: f32[1,256], index: 1, kind: output, shape index: {0}]   ;;  %s396_s2 = inlined_call_operand.vmem [shape: f32[1,256], index: 2, kind: output, shape index: {1}]  }
   0x1   :  { %v135_v1 = vld [vmem:[%s394_s0] sm:$0xf]  ;;  %v136_v2 = vld [vmem:[%s394_s0 + $0x4] sm:$0xf]  ;;  %v137_v3 = vld [vmem:[%s394_s0 + $0x8] sm:$0xf]  ;;  %v154_v5 = vunpack.c.l.s4 %v343_v4 }
   0x2   :  { %v372_v6 = vshrl.u32 %v117_v0, 7  ;;  %v138_v7 = vld [vmem:[%s394_s0 + $0xc] sm:$0xf]  ;;  %v139_v8 = vand.u32 2147483647, %v135_v1  ;;  %vm143_vm1 = vcmp.gt.f32.partialorder %v135_v1, 0.0 }
   0x3   :  { %v140_v9 = vand.u32 2147483647, %v136_v2  ;;  %v141_v10 = vand.u32 2147483647, %v137_v3  ;;  %v142_v11 = vand.u32 2147483647, %v138_v7  ;;  %v155_v12 = vunpack.c.0.s8 %v154_v5 }
   0x4   :  { %vm120_vm0 = vcmp.lt.s32.totalorder %v372_v6, 2  ;;  %vm144_vm2 = vcmp.gt.f32.partialorder %v136_v2, 0.0  ;;  %vm145_vm3 = vcmp.gt.f32.partialorder %v137_v3, 0.0  ;;  %vm146_vm6 = vcmp.gt.f32.partialorder %v138_v7, 0.0 }
   0x5   :  { %v151_v13 = vcombine.low %v139_v8, %v140_v9  ;;  %v152_v14 = vcombine.low %v141_v10, %v142_v11  ;;  %v158_v15 = vsub.s32 %v155_v12, %v372_v6  ;;  %v173_v17 = vsel %vm120_vm0, 1, %v344_v16 }
   0x6   :  { %v175_v18 = vcombine.low %v173_v17, %v173_v17  ;;  %v176_v19 = vcombine.high %v173_v17, %v173_v17  ;;  %v346_v43 = vmov 1966171168   ;;  %vm287_vm13 = vcmp.lt.s32.totalorder %v117_v0, 256 }
   0x7   :  { %v159_v20 = vrot.slane %v151_v13, %v158_v15  ;;  %v166_v21 = vrot.slane %v152_v14, %v158_v15  ;;  %v271_v44 = vunpack.c.l.s4 %v346_v43 }
   0x8   :  { %v183_v22 = vrot.slane %v175_v18, %v158_v15  ;;  %v190_v23 = vrot.slane %v176_v19, %v158_v15 }
   0x9   :  { %v167_v24 = vcombine.low %v159_v20, %v166_v21  ;;  %v168_v25 = vcombine.high %v159_v20, %v166_v21  ;;  %v272_v53 = vunpack.c.0.s8 %v271_v44 }
   0xa   :  { %v191_v26 = vcombine.high %v183_v22, %v183_v22  ;;  %v192_v27 = vcombine.high %v190_v23, %v190_v23  ;;  %vm193_vm4 = vcmp.ne.s32.totalorder %v183_v22, 0  ;;  %vm195_vm5 = vcmp.ne.s32.totalorder %v190_v23, 0 }
   0xb   :  { %v171_v28 = vsel %vm120_vm0, %v167_v24, 0.0  ;;  %v172_v29 = vsel %vm120_vm0, %v168_v25, 0.0  ;;  %vm197_vm7 = vmand %vm143_vm1, %vm193_vm4  ;;  %v275_v62 = vsub.s32 %v272_v53, %v372_v6 }
   0xc   :  { %vm194_vm8 = vcmp.ne.s32.totalorder %v191_v26, 0  ;;  %vm196_vm9 = vcmp.ne.s32.totalorder %v192_v27, 0  ;;  %vm199_vm10 = vmand %vm145_vm3, %vm195_vm5  ;;  %v335_v31 = vsel %vm197_vm7, 1.0, %v345_v30  ;;  %v253_v32 = vrot.slane %v171_v28, 4 }
   0xd   :  { %vm198_vm11 = vmand %vm144_vm2, %vm194_vm8  ;;  %v337_v33 = vsel %vm199_vm10, 1.0, %v345_v30  ;;  %v259_v34 = vrot.slane %v172_v29, 4 }
   0xe   :  { %vm200_vm12 = vmand %vm146_vm6, %vm196_vm9  ;;  %v336_v35 = vsel %vm198_vm11, 1.0, %v345_v30  ;;  %v254_v36 = vadd.f32 %v253_v32, %v171_v28 }
   0xf   :  { %v338_v37 = vsel %vm200_vm12, 1.0, %v345_v30  ;;  %v260_v38 = vadd.f32 %v259_v34, %v172_v29  ;;  %v227_v39 = vcombine.low %v335_v31, %v336_v35 }
  0x10   :  { %v255_v40 = vrot.slane %v254_v36, 2  ;;  %v228_v41 = vcombine.low %v337_v33, %v338_v37 }
  0x11   :  { %v261_v42 = vrot.slane %v260_v38, 2  ;;  %v235_v45 = vrot.slane %v227_v39, %v158_v15 }
  0x12   :  { %v256_v46 = vadd.f32 %v255_v40, %v254_v36  ;;  %v242_v47 = vrot.slane %v228_v41, %v158_v15 }
  0x13   :  { %v262_v48 = vadd.f32 %v261_v42, %v260_v38 }
  0x14   :  { %v257_v49 = vrot.slane %v256_v46, 1  ;;  %v243_v50 = vcombine.low %v235_v45, %v242_v47  ;;  %v244_v51 = vcombine.high %v235_v45, %v242_v47 }
  0x15   :  { %v263_v52 = vrot.slane %v262_v48, 1 }
  0x16   :  { %v258_v54 = vadd.f32 %v257_v49, %v256_v46  ;;  %v292_v55 = vrot.slane %v243_v50, 4  ;;  %v298_v56 = vrot.slane %v244_v51, 4 }
  0x17   :  { %v264_v57 = vadd.f32 %v263_v52, %v262_v48 }
  0x18   :  { %v265_v58 = vmul.f32 %v258_v54, %v258_v54  ;;  %v293_v59 = vadd.f32 %v292_v55, %v243_v50  ;;  %v299_v60 = vadd.f32 %v298_v56, %v244_v51 }
  0x19   :  { %v266_v61 = vmul.f32 %v264_v57, %v264_v57 }
  0x1a   :  { %v294_v63 = vrot.slane %v293_v59, 2  ;;  %v300_v1 = vrot.slane %v299_v60, 2 }
  0x1b   :  { %v269_v2 = vcombine.low %v265_v58, %v266_v61 }
  0x1c   :  { %v295_v3 = vadd.f32 %v294_v63, %v293_v59  ;;  %v301_v4 = vadd.f32 %v300_v1, %v299_v60 }
  0x1d   :  { %v276_v5 = vrot.slane %v269_v2, %v275_v62 }
  0x1e   :  { %v296_v7 = vrot.slane %v295_v3, 1  ;;  %v302_v8 = vrot.slane %v301_v4, 1 }
  0x1f   :  { %v283_v9 = vrot.slane %v276_v5, %v275_v62 }
  0x20   :  { %v297_v10 = vadd.f32 %v296_v7, %v295_v3  ;;  %v303_v11 = vadd.f32 %v302_v8, %v301_v4 }
  0x21   :  { %289 = vst.msk [vmem:[%s395_s1] sm:$0x3] %vm287_vm13, %v283_v9 }
  0x22   :  { %v306_v12 = vcombine.low %v297_v10, %v303_v11 }
  0x24   :  { %v313_v13 = vrot.slane %v306_v12, %v275_v62 }
  0x26   :  { %v320_v6 = vrot.slane %v313_v13, %v275_v62 }
  0x28   :  { %322 = vst.msk [vmem:[%s396_s2] sm:$0x3] %vm287_vm13, %v320_v6 }

</bundles_post_ra>
